<compile_context>
chip_gen: v7x
topology: tpu7x:2x2x1
jax: 0.10.0
libtpu: 0.0.40
codegen_flags: <defaults>
</compile_context>

<pallas_src>
from functools import partial

import jax
import jax.numpy as jnp
from jax import lax
from jax.experimental import pallas as pl
from jax.experimental.pallas import tpu as pltpu

# ----- small, module-consistent sizes -----
B = 2              # batch
S = 16             # sequence length
V = 128            # vocab size (lane-aligned)
H = 32             # hidden size
GEN_MAX_LEN = 8    # max_new_tokens / gen_max_len
PAD_ID = 0
MAX_DECAY_LEN = 64  # module uses 2048; 64 is enough for S=16
LANE = 128

_VMEM = pl.BlockSpec(memory_space=pltpu.MemorySpace.VMEM)
_SMEM = pl.BlockSpec(memory_space=pltpu.MemorySpace.SMEM)

# aux slab column layout (lane-dense packing of all former [N,1] operands)
_COL_IDS, _COL_AMD, _COL_SEL, _COL_MSK = 0, 1, 2, 3


# ---------------------------------------------------------------------------
# Fused PPO-epoch kernel: one-hot lookup + fused LM/value head + log_softmax/
# gather + block-diagonal GAE + clipped surrogate / critic loss, one call.
# ---------------------------------------------------------------------------
def _ppo_fused_kernel(aux_ref, embed_ref, wcomb_ref, dsubT_ref,
                      logits_ref, loss_ref, *,
                      epsilon, alpha, beta, gamma, n_adv, bsz, seq, vocab):
    n = bsz * seq

    aux = aux_ref[...]                                       # [N, 128] lane-dense slab
    ids = aux[:, _COL_IDS:_COL_IDS + 1].astype(jnp.int32)    # token ids (< V, exact in f32)
    amd = aux[:, _COL_AMD:_COL_AMD + 1]                      # (action_rewards*mask) @ decay
    sel = aux[:, _COL_SEL:_COL_SEL + 1]                      # 1.0 on last gen_max_len positions
    msk = aux[:, _COL_MSK:_COL_MSK + 1]                      # padding mask

    # ---- actor: one-hot embedding lookup + fused LM/value head (bf16 MXU, f32 acc) ----
    # TODO(synk): at real vocab sizes replace the one-hot lookup with a scalar-prefetched
    # row gather (PrefetchScalarGridSpec + pl.ds) instead of an [N,V] operand.
    vocab_iota = lax.broadcasted_iota(jnp.int32, (n, vocab), 1)
    onehot = (vocab_iota == ids).astype(jnp.bfloat16)                      # [N, V] exact 0/1
    x = jnp.dot(onehot, embed_ref[...], preferred_element_type=jnp.float32)  # [N, H] f32
    out = jnp.dot(x.astype(jnp.bfloat16), wcomb_ref[...],
                  preferred_element_type=jnp.float32)                      # [N, V+128]
    logits = out[:, :vocab]                                                # [N, V]
    logits_ref[...] = logits                                               # lane-dense output

    # ---- log_softmax + gather of each token's log-prob under the previous step ----
    # shifted[t] = logits[t-1] via a 1-sublane roll (XLU); rows that wrap (t % S == 0)
    # are never selected, so the wrap is benign.
    shifted = pltpu.roll(logits, shift=1, axis=0)
    mrow = jnp.max(shifted, axis=-1, keepdims=True)
    lse = mrow + jnp.log(jnp.sum(jnp.exp(shifted - mrow), axis=-1, keepdims=True))
    gathered = jnp.sum(shifted * onehot.astype(jnp.float32), axis=-1, keepdims=True)
    log_probs = gathered - lse                                             # [N, 1]
    # FT path: old and new log-probs come from the same frozen actor -> ratio == 1
    # exactly; kept for fidelity with the torch per-epoch recompute.
    ratio = jnp.exp(log_probs - log_probs)                                 # [N, 1]

    # ---- critic values + GAE (block-diagonal: one [S,S] decay matmul per batch) ----
    vals_blk = out[:, vocab:]                                   # [N,128], col 0 = real head
    vals_next_blk = pltpu.roll(vals_blk, shift=n - 1, axis=0)   # flattened roll(-1), wraps
    deltas_blk = (vals_next_blk - vals_blk) * msk               # [N,128]

    actor_sum = jnp.float32(0.0)
    critic_sum = jnp.float32(0.0)
    for b in range(bsz):                                        # static unroll, B small
        lo = b * seq
        gae_blk = jnp.dot(dsubT_ref[...], deltas_blk[lo:lo + seq, :],
                          preferred_element_type=jnp.float32)   # [S,128] (col 0 real)
        adv = gae_blk[:, 0:1] + amd[lo:lo + seq, :]             # [S,1]
        sel_b = sel[lo:lo + seq, :]
        ratio_b = ratio[lo:lo + seq, :]
        surr1 = ratio_b * adv
        surr2 = jnp.clip(ratio_b, 1.0 - epsilon, 1.0 + epsilon) * adv
        actor_sum = actor_sum + jnp.sum(
            jnp.where(sel_b > 0, jnp.minimum(surr1, surr2), 0.0))
        critic_sum = critic_sum + jnp.sum(jnp.where(sel_b > 0, adv * adv, 0.0))

    actor_loss = -actor_sum / n_adv
    critic_loss = critic_sum / n_adv
    entropy = 0.0                         # module uses a constant 0 entropy term
    loss_ref[0, 0] = alpha * actor_loss + beta * critic_loss - gamma * entropy


def _ppo_fused_call(aux, embed_bf16, wcomb_bf16, dsubT, *,
                    epsilon, alpha, beta, gamma, n_adv, bsz, seq, vocab):
    n = bsz * seq
    kernel = partial(_ppo_fused_kernel,
                     epsilon=float(epsilon), alpha=float(alpha), beta=float(beta),
                     gamma=float(gamma), n_adv=float(n_adv),
                     bsz=bsz, seq=seq, vocab=vocab)
    # TODO(synk): at real N, add grid=(N/tm,) with dimension_semantics=("parallel",...)
    # (v7x megacore) and 256-multiple tiles sized against v7x's 64 MiB VMEM; grid-less
    # is the fastest option at this toy size (extra grid steps are pure overhead on
    # the single-TC v5e/v6e).
    return pl.pallas_call(
        kernel,
        out_shape=(jax.ShapeDtypeStruct((n, vocab), jnp.float32),   # logits [B*S, V]
                   jax.ShapeDtypeStruct((1, 1), jnp.float32)),      # loss
        in_specs=[_VMEM, _VMEM, _VMEM, _VMEM],
        out_specs=(_VMEM, _SMEM),
    )(aux, embed_bf16, wcomb_bf16, dsubT)


# ---------------------------------------------------------------------------
# Glue: decay matrix, preprocessing, PPO.forward (FT path) generator
# ---------------------------------------------------------------------------
def get_decay_up_matrix_T(max_length=MAX_DECAY_LEN, gamma=0.99, tau=0.95):
    decay = gamma * tau
    decay_row = jnp.ones((max_length,), jnp.float32) * decay
    decay_row = decay_row.at[0].set(1.0)
    c = jnp.cumprod(decay_row)                            # c[k] = decay**k
    i = jnp.arange(max_length)[:, None]
    j = jnp.arange(max_length)[None, :]
    decay_up_matrix = jnp.where(j >= i, c[jnp.maximum(j - i, 0)], 0.0)
    return decay_up_matrix.T                              # lower triangular


def ppo_forward(input_ids, last_input_len, reward, params,
                ppo_epochs=3, ppo_epislon=0.15, alpha=0.5, beta=0.5, gamma=0.0):
    """Generator mirroring PPO.forward with is_rlhf=False (FT path).

    `last_input_len` must be host-side ints (list/tuple) so the
    torch.max(...).item() equivalent needs no device->host sync.
    """
    embed, w_lm, w_v, decay_T = params
    bsz, seq = input_ids.shape
    vocab, hid = embed.shape
    n = bsz * seq
    g = int(max(last_input_len))          # max_new_tokens, host-only
    assert 0 < g < seq

    # -------- one-time (loop-invariant) preprocessing in plain JAX --------
    sequences = input_ids                                   # generate_with_ft
    masks = (sequences != PAD_ID).astype(jnp.float32)       # [B, S]
    rewards = jnp.zeros((bsz, seq), jnp.float32)
    # FT path: sequences[:, input_ids.shape[-1]:] is empty -> final pos = seq - 1
    final_position = ((sequences[:, input_ids.shape[-1]:] != PAD_ID).sum(axis=-1)
                      + input_ids.shape[-1] - 1)
    rewards = rewards.at[jnp.arange(bsz), final_position].set(reward[:, 0])

    # action_rewards uses torch's FLATTENED roll(-1) (wraps across batch rows; wrapped
    # positions are masked / never selected — keep this invariant if N is ever tiled).
    r_flat = rewards.reshape(-1)
    m_flat = masks.reshape(-1)
    a_flat = (jnp.roll(r_flat, -1) + r_flat) * 0.5
    d_sub = decay_T[:seq, :seq]
    # reward part of GAE is parameter-independent -> fold per batch (block-diag decay)
    amd = ((a_flat * m_flat).reshape(bsz, seq) @ d_sub).reshape(n)
    sel = ((jnp.arange(n) % seq) >= seq - g).astype(jnp.float32)

    # pack every [N,1] operand into one lane-dense [N,128] aux slab (cols 0..3 used)
    aux = jnp.zeros((n, LANE), jnp.float32)
    aux = aux.at[:, _COL_IDS].set(sequences.reshape(n).astype(jnp.float32))
    aux = aux.at[:, _COL_AMD].set(amd)
    aux = aux.at[:, _COL_SEL].set(sel)
    aux = aux.at[:, _COL_MSK].set(m_flat)

    # fuse LM head and (lane-padded) value head into one [H, V+128] weight
    wcomb = jnp.zeros((hid, vocab + LANE), jnp.float32)
    wcomb = wcomb.at[:, :vocab].set(w_lm)
    wcomb = wcomb.at[:, vocab].set(w_v[:, 0])

    # -------- single fused kernel call (hoisted out of the epoch loop) --------
    logits2d, loss = _ppo_fused_call(
        aux, embed.astype(jnp.bfloat16), wcomb.astype(jnp.bfloat16), d_sub.T,
        epsilon=ppo_epislon, alpha=alpha, beta=beta, gamma=gamma,
        n_adv=bsz * g, bsz=bsz, seq=seq, vocab=vocab)
    logits = logits2d.reshape(bsz, seq, vocab)

    # torch breaks on isinf(ratio); in the FT path ratio == exp(0) == 1 exactly so the
    # branch can never fire -> the flag output and its device->host sync are dropped.
    for _ in range(ppo_epochs):
        # actor/critic parameters never change inside this loop, so every epoch's
        # recomputation is identical -> reuse the single fused result.
        yield loss[0, 0], logits


# ---------------------------------------------------------------------------
# Pure-JAX reference of the same FT forward path (for a correctness check)
# ---------------------------------------------------------------------------
def _reference_forward(input_ids, gen_max_len, reward, params,
                       ppo_epislon=0.15, alpha=0.5, beta=0.5, gamma=0.0):
    embed, w_lm, w_v, decay_T = params
    bsz, seq = input_ids.shape
    g = int(gen_max_len)
    x = jnp.take(embed, input_ids.reshape(-1), axis=0)
    logits = (x @ w_lm).reshape(bsz, seq, -1)
    lsm = jax.nn.log_softmax(logits[:, -(g + 1):-1, :], axis=-1)
    tgt = input_ids[:, -g:]
    log_probs = jnp.take_along_axis(lsm, tgt[:, :, None], axis=-1)[..., 0]
    values = (x @ w_v).reshape(bsz, seq)
    masks = (input_ids != PAD_ID).astype(jnp.float32)
    rewards = jnp.zeros((bsz, seq), jnp.float32)
    rewards = rewards.at[jnp.arange(bsz), seq - 1].set(reward[:, 0])

    def flat_roll(t):
        return jnp.roll(t.reshape(-1), -1).reshape(t.shape)

    action_rewards = (flat_roll(rewards) + rewards) * 0.5
    deltas = (action_rewards + flat_roll(values) - values) * masks
    gae = deltas @ decay_T[:seq, :seq]
    adv = gae[:, -g:]
    ratio = jnp.exp(log_probs - log_probs)
    surr1 = ratio * adv
    surr2 = jnp.clip(ratio, 1.0 - ppo_epislon, 1.0 + ppo_epislon) * adv
    actor_loss = -jnp.mean(jnp.minimum(surr1, surr2))
    critic_loss = jnp.mean(adv ** 2)
    loss = alpha * actor_loss + beta * critic_loss - gamma * 0.0
    return loss, logits


# ---------------------------------------------------------------------------
if __name__ == "__main__":
    key = jax.random.PRNGKey(0)
    k_emb, k_lm, k_v, k_ids, k_rw = jax.random.split(key, 5)

    # deterministic synthetic parameters
    embed = jax.random.normal(k_emb, (V, H), jnp.float32) * 0.1
    w_lm = jax.random.normal(k_lm, (H, V), jnp.float32) * 0.1
    w_v = jax.random.normal(k_v, (H, 1), jnp.float32) * 0.1
    decay_T = get_decay_up_matrix_T()

    # deterministic inputs
    input_ids = jax.random.randint(k_ids, (B, S), 1, V, dtype=jnp.int32)
    input_ids = input_ids.at[1, -2:].set(PAD_ID)          # a bit of padding
    last_input_len = [GEN_MAX_LEN] * B                    # host ints: no device sync
    reward = jax.random.uniform(k_rw, (B, 1), jnp.float32)

    params = (embed, w_lm, w_v, decay_T)
    outputs = list(ppo_forward(input_ids, last_input_len, reward, params,
                               ppo_epochs=3))
    assert len(outputs) == 3
    for loss, logits in outputs:
        jax.block_until_ready(loss)
        jax.block_until_ready(logits)
        assert logits.shape == (B, S, V)

    # correctness check against a plain-JAX f32 reference of the same forward path
    ref_loss, ref_logits = _reference_forward(input_ids, max(last_input_len),
                                              reward, params)
    assert bool(jnp.allclose(outputs[0][1], ref_logits, rtol=2e-2, atol=2e-2)), \
        "logits mismatch"
    assert bool(jnp.allclose(outputs[0][0], ref_loss, rtol=2e-2, atol=2e-2)), \
        "loss mismatch"

    print("KERNEL_OK")
</pallas_src>

<mosaic_0001>
module attributes {stable_mosaic.version = 11 : i64} {
  func.func @_ppo_fused_kernel(%arg0: memref<32x128xf32, #tpu.memory_space<vmem>>, %arg1: memref<128x32xbf16, #tpu.memory_space<vmem>>, %arg2: memref<32x256xbf16, #tpu.memory_space<vmem>>, %arg3: memref<16x16xf32, #tpu.memory_space<vmem>>, %arg4: memref<32x128xf32, #tpu.memory_space<vmem>>, %arg5: memref<1x1xf32, #tpu.memory_space<smem>>) attributes {dimension_semantics = [], scalar_prefetch = 0 : i64, scratch_operands = 0 : i64, tpu.core_type = #tpu.core_type<tc>} {
    %c0 = arith.constant 0 : index
    %c0_0 = arith.constant 0 : index
    %0 = vector.load %arg0[%c0, %c0_0] : memref<32x128xf32, #tpu.memory_space<vmem>>, vector<32x128xf32>
    %1 = vector.extract_strided_slice %0 {offsets = [0, 0], sizes = [32, 1], strides = [1, 1]} : vector<32x128xf32> to vector<32x1xf32>
    %2 = arith.fptosi %1 : vector<32x1xf32> to vector<32x1xi32>
    %3 = vector.extract_strided_slice %0 {offsets = [0, 1], sizes = [32, 1], strides = [1, 1]} : vector<32x128xf32> to vector<32x1xf32>
    %4 = vector.extract_strided_slice %0 {offsets = [0, 2], sizes = [32, 1], strides = [1, 1]} : vector<32x128xf32> to vector<32x1xf32>
    %5 = vector.extract_strided_slice %0 {offsets = [0, 3], sizes = [32, 1], strides = [1, 1]} : vector<32x128xf32> to vector<32x1xf32>
    %6 = tpu.iota {dimensions = array<i32: 1>} : vector<32x128xi32>
    %7 = vector.broadcast %2 : vector<32x1xi32> to vector<32x128xi32>
    %8 = arith.cmpi eq, %6, %7 : vector<32x128xi32>
    %9 = arith.extui %8 : vector<32x128xi1> to vector<32x128xi32>
    %10 = arith.sitofp %9 : vector<32x128xi32> to vector<32x128xf32>
    %11 = arith.truncf %10 : vector<32x128xf32> to vector<32x128xbf16>
    %c0_1 = arith.constant 0 : index
    %c0_2 = arith.constant 0 : index
    %12 = vector.load %arg1[%c0_1, %c0_2] : memref<128x32xbf16, #tpu.memory_space<vmem>>, vector<128x32xbf16>
    %cst = arith.constant dense<0.000000e+00> : vector<32x32xf32>
    %13 = tpu.matmul %11, %12, %cst {dimension_numbers = #tpu.dot_dimension_numbers<[1], [0], [0], [1], [0, 0, 1, 1], [], []>} : vector<32x128xbf16>, vector<128x32xbf16>, vector<32x32xf32> -> vector<32x32xf32>
    %14 = arith.truncf %13 : vector<32x32xf32> to vector<32x32xbf16>
    %c0_3 = arith.constant 0 : index
    %c0_4 = arith.constant 0 : index
    %15 = vector.load %arg2[%c0_3, %c0_4] : memref<32x256xbf16, #tpu.memory_space<vmem>>, vector<32x256xbf16>
    %cst_5 = arith.constant dense<0.000000e+00> : vector<32x256xf32>
    %16 = tpu.matmul %14, %15, %cst_5 {dimension_numbers = #tpu.dot_dimension_numbers<[1], [0], [0], [1], [0, 0, 1, 1], [], []>} : vector<32x32xbf16>, vector<32x256xbf16>, vector<32x256xf32> -> vector<32x256xf32>
    %17 = vector.extract_strided_slice %16 {offsets = [0, 0], sizes = [32, 128], strides = [1, 1]} : vector<32x256xf32> to vector<32x128xf32>
    %c0_6 = arith.constant 0 : index
    %c0_7 = arith.constant 0 : index
    %18 = vector.load %arg4[%c0_6, %c0_7] : memref<32x128xf32, #tpu.memory_space<vmem>>, vector<32x128xf32>
    tpu.vector_store %arg4[%c0_6, %c0_7], %17 {strides = array<i32>} : memref<32x128xf32, #tpu.memory_space<vmem>>, vector<32x128xf32>,
    %c1_i32 = arith.constant 1 : i32
    %19 = tpu.dynamic_rotate %17 by %c1_i32 dim 0 : vector<32x128xf32>, i32 -> vector<32x128xf32>
    %cst_8 = arith.constant dense<0xFF800000> : vector<32xf32>
    %20 = vector.multi_reduction <maximumf>, %19, %cst_8 [1] : vector<32x128xf32> to vector<32xf32>
    %21 = vector.shape_cast %20 : vector<32xf32> to vector<32x1xf32>
    %22 = vector.broadcast %21 : vector<32x1xf32> to vector<32x128xf32>
    %23 = arith.subf %19, %22 : vector<32x128xf32>
    %24 = math.exp %23 : vector<32x128xf32>
    %cst_9 = arith.constant dense<0.000000e+00> : vector<32xf32>
    %25 = vector.multi_reduction <add>, %24, %cst_9 [1] : vector<32x128xf32> to vector<32xf32>
    %26 = vector.shape_cast %25 : vector<32xf32> to vector<32x1xf32>
    %27 = math.log %26 : vector<32x1xf32>
    %28 = arith.addf %21, %27 : vector<32x1xf32>
    %29 = arith.extf %11 : vector<32x128xbf16> to vector<32x128xf32>
    %30 = arith.mulf %19, %29 : vector<32x128xf32>
    %cst_10 = arith.constant dense<0.000000e+00> : vector<32xf32>
    %31 = vector.multi_reduction <add>, %30, %cst_10 [1] : vector<32x128xf32> to vector<32xf32>
    %32 = vector.shape_cast %31 : vector<32xf32> to vector<32x1xf32>
    %33 = arith.subf %32, %28 : vector<32x1xf32>
    %34 = arith.subf %33, %33 : vector<32x1xf32>
    %35 = math.exp %34 : vector<32x1xf32>
    %36 = vector.extract_strided_slice %16 {offsets = [0, 128], sizes = [32, 128], strides = [1, 1]} : vector<32x256xf32> to vector<32x128xf32>
    %c31_i32 = arith.constant 31 : i32
    %37 = tpu.dynamic_rotate %36 by %c31_i32 dim 0 : vector<32x128xf32>, i32 -> vector<32x128xf32>
    %38 = arith.subf %37, %36 : vector<32x128xf32>
    %39 = vector.broadcast %5 : vector<32x1xf32> to vector<32x128xf32>
    %40 = arith.mulf %38, %39 : vector<32x128xf32>
    %c0_11 = arith.constant 0 : index
    %c0_12 = arith.constant 0 : index
    %41 = vector.load %arg3[%c0_11, %c0_12] : memref<16x16xf32, #tpu.memory_space<vmem>>, vector<16x16xf32>
    %42 = vector.extract_strided_slice %40 {offsets = [0, 0], sizes = [16, 128], strides = [1, 1]} : vector<32x128xf32> to vector<16x128xf32>
    %cst_13 = arith.constant dense<0.000000e+00> : vector<16x128xf32>
    %43 = tpu.matmul %41, %42, %cst_13 {dimension_numbers = #tpu.dot_dimension_numbers<[1], [0], [0], [1], [0, 0, 1, 1], [], []>} : vector<16x16xf32>, vector<16x128xf32>, vector<16x128xf32> -> vector<16x128xf32>
    %44 = vector.extract_strided_slice %43 {offsets = [0, 0], sizes = [16, 1], strides = [1, 1]} : vector<16x128xf32> to vector<16x1xf32>
    %45 = vector.extract_strided_slice %3 {offsets = [0, 0], sizes = [16, 1], strides = [1, 1]} : vector<32x1xf32> to vector<16x1xf32>
    %46 = arith.addf %44, %45 : vector<16x1xf32>
    %47 = vector.extract_strided_slice %4 {offsets = [0, 0], sizes = [16, 1], strides = [1, 1]} : vector<32x1xf32> to vector<16x1xf32>
    %48 = vector.extract_strided_slice %35 {offsets = [0, 0], sizes = [16, 1], strides = [1, 1]} : vector<32x1xf32> to vector<16x1xf32>
    %49 = arith.mulf %48, %46 : vector<16x1xf32>
    %cst_14 = arith.constant 8.500000e-01 : f32
    %cst_15 = arith.constant 1.150000e+00 : f32
    %50 = vector.broadcast %cst_14 : f32 to vector<16x1xf32>
    %51 = arith.maximumf %50, %48 : vector<16x1xf32>
    %52 = vector.broadcast %cst_15 : f32 to vector<16x1xf32>
    %53 = arith.minimumf %52, %51 : vector<16x1xf32>
    %54 = arith.mulf %53, %46 : vector<16x1xf32>
    %cst_16 = arith.constant 0.000000e+00 : f32
    %55 = vector.broadcast %cst_16 : f32 to vector<16x1xf32>
    %56 = arith.cmpf ogt, %47, %55 : vector<16x1xf32>
    %57 = arith.minimumf %49, %54 : vector<16x1xf32>
    %cst_17 = arith.constant 0.000000e+00 : f32
    %58 = vector.broadcast %cst_17 : f32 to vector<16x1xf32>
    %59 = arith.select %56, %57, %58 : vector<16x1xi1>, vector<16x1xf32>
    %60 = vector.shape_cast %59 : vector<16x1xf32> to vector<1x16x1xf32>
    %cst_18 = arith.constant dense<0.000000e+00> : vector<1xf32>
    %61 = vector.multi_reduction <add>, %60, %cst_18 [1, 2] : vector<1x16x1xf32> to vector<1xf32>
    %62 = vector.shape_cast %61 : vector<1xf32> to vector<1x1x1xf32>
    %63 = vector.extract %62[0, 0, 0] : f32 from vector<1x1x1xf32>
    %cst_19 = arith.constant 0.000000e+00 : f32
    %64 = arith.addf %cst_19, %63 : f32
    %cst_20 = arith.constant 0.000000e+00 : f32
    %65 = vector.broadcast %cst_20 : f32 to vector<16x1xf32>
    %66 = arith.cmpf ogt, %47, %65 : vector<16x1xf32>
    %67 = arith.mulf %46, %46 : vector<16x1xf32>
    %cst_21 = arith.constant 0.000000e+00 : f32
    %68 = vector.broadcast %cst_21 : f32 to vector<16x1xf32>
    %69 = arith.select %66, %67, %68 : vector<16x1xi1>, vector<16x1xf32>
    %70 = vector.shape_cast %69 : vector<16x1xf32> to vector<1x16x1xf32>
    %cst_22 = arith.constant dense<0.000000e+00> : vector<1xf32>
    %71 = vector.multi_reduction <add>, %70, %cst_22 [1, 2] : vector<1x16x1xf32> to vector<1xf32>
    %72 = vector.shape_cast %71 : vector<1xf32> to vector<1x1x1xf32>
    %73 = vector.extract %72[0, 0, 0] : f32 from vector<1x1x1xf32>
    %cst_23 = arith.constant 0.000000e+00 : f32
    %74 = arith.addf %cst_23, %73 : f32
    %c0_24 = arith.constant 0 : index
    %c0_25 = arith.constant 0 : index
    %75 = vector.load %arg3[%c0_24, %c0_25] : memref<16x16xf32, #tpu.memory_space<vmem>>, vector<16x16xf32>
    %76 = vector.extract_strided_slice %40 {offsets = [16, 0], sizes = [16, 128], strides = [1, 1]} : vector<32x128xf32> to vector<16x128xf32>
    %cst_26 = arith.constant dense<0.000000e+00> : vector<16x128xf32>
    %77 = tpu.matmul %75, %76, %cst_26 {dimension_numbers = #tpu.dot_dimension_numbers<[1], [0], [0], [1], [0, 0, 1, 1], [], []>} : vector<16x16xf32>, vector<16x128xf32>, vector<16x128xf32> -> vector<16x128xf32>
    %78 = vector.extract_strided_slice %77 {offsets = [0, 0], sizes = [16, 1], strides = [1, 1]} : vector<16x128xf32> to vector<16x1xf32>
    %79 = vector.extract_strided_slice %3 {offsets = [16, 0], sizes = [16, 1], strides = [1, 1]} : vector<32x1xf32> to vector<16x1xf32>
    %80 = arith.addf %78, %79 : vector<16x1xf32>
    %81 = vector.extract_strided_slice %4 {offsets = [16, 0], sizes = [16, 1], strides = [1, 1]} : vector<32x1xf32> to vector<16x1xf32>
    %82 = vector.extract_strided_slice %35 {offsets = [16, 0], sizes = [16, 1], strides = [1, 1]} : vector<32x1xf32> to vector<16x1xf32>
    %83 = arith.mulf %82, %80 : vector<16x1xf32>
    %cst_27 = arith.constant 8.500000e-01 : f32
    %cst_28 = arith.constant 1.150000e+00 : f32
    %84 = vector.broadcast %cst_27 : f32 to vector<16x1xf32>
    %85 = arith.maximumf %84, %82 : vector<16x1xf32>
    %86 = vector.broadcast %cst_28 : f32 to vector<16x1xf32>
    %87 = arith.minimumf %86, %85 : vector<16x1xf32>
    %88 = arith.mulf %87, %80 : vector<16x1xf32>
    %cst_29 = arith.constant 0.000000e+00 : f32
    %89 = vector.broadcast %cst_29 : f32 to vector<16x1xf32>
    %90 = arith.cmpf ogt, %81, %89 : vector<16x1xf32>
    %91 = arith.minimumf %83, %88 : vector<16x1xf32>
    %cst_30 = arith.constant 0.000000e+00 : f32
    %92 = vector.broadcast %cst_30 : f32 to vector<16x1xf32>
    %93 = arith.select %90, %91, %92 : vector<16x1xi1>, vector<16x1xf32>
    %94 = vector.shape_cast %93 : vector<16x1xf32> to vector<1x16x1xf32>
    %cst_31 = arith.constant dense<0.000000e+00> : vector<1xf32>
    %95 = vector.multi_reduction <add>, %94, %cst_31 [1, 2] : vector<1x16x1xf32> to vector<1xf32>
    %96 = vector.shape_cast %95 : vector<1xf32> to vector<1x1x1xf32>
    %97 = vector.extract %96[0, 0, 0] : f32 from vector<1x1x1xf32>
    %98 = arith.addf %64, %97 : f32
    %cst_32 = arith.constant 0.000000e+00 : f32
    %99 = vector.broadcast %cst_32 : f32 to vector<16x1xf32>
    %100 = arith.cmpf ogt, %81, %99 : vector<16x1xf32>
    %101 = arith.mulf %80, %80 : vector<16x1xf32>
    %cst_33 = arith.constant 0.000000e+00 : f32
    %102 = vector.broadcast %cst_33 : f32 to vector<16x1xf32>
    %103 = arith.select %100, %101, %102 : vector<16x1xi1>, vector<16x1xf32>
    %104 = vector.shape_cast %103 : vector<16x1xf32> to vector<1x16x1xf32>
    %cst_34 = arith.constant dense<0.000000e+00> : vector<1xf32>
    %105 = vector.multi_reduction <add>, %104, %cst_34 [1, 2] : vector<1x16x1xf32> to vector<1xf32>
    %106 = vector.shape_cast %105 : vector<1xf32> to vector<1x1x1xf32>
    %107 = vector.extract %106[0, 0, 0] : f32 from vector<1x1x1xf32>
    %108 = arith.addf %74, %107 : f32
    %cst_35 = arith.constant 0.000000e+00 : f32
    %109 = arith.subf %cst_35, %98 : f32
    %cst_36 = arith.constant 1.600000e+01 : f32
    %110 = arith.divf %109, %cst_36 : f32
    %cst_37 = arith.constant 1.600000e+01 : f32
    %111 = arith.divf %108, %cst_37 : f32
    %cst_38 = arith.constant 5.000000e-01 : f32
    %112 = arith.mulf %cst_38, %110 : f32
    %cst_39 = arith.constant 5.000000e-01 : f32
    %113 = arith.mulf %cst_39, %111 : f32
    %114 = arith.addf %112, %113 : f32
    %cst_40 = arith.constant 0.000000e+00 : f32
    %115 = arith.subf %114, %cst_40 : f32
    %c0_41 = arith.constant 0 : index
    %c0_42 = arith.constant 0 : index
    %116 = memref.load %arg5[%c0_41, %c0_42] : memref<1x1xf32, #tpu.memory_space<smem>>
    memref.store %115, %arg5[%c0_41, %c0_42] : memref<1x1xf32, #tpu.memory_space<smem>>
    return
  }
}

</mosaic_0001>

<bundles_post_ra>
// kernel: tpu_custom_call.1
= control target key start
LH: loop header
LB: loop body
LE: loop exit
PB: predicated region body
PF: predicated region fallthrough
CT: control target
= control target key end

     0   :  { %11 = vsyncpa [#allocation3], 0  ;;  %v941_v3 = vmov 0   ;;  %s1186_s0 = inlined_call_operand.vmem [shape: f32[32,128], index: 0, kind: input, shape index: {}]   ;;  %s1187_s1 = inlined_call_operand.vmem [shape: bf16[128,32], index: 1, kind: input, shape index: {}]   ;;  %s1188_s2 = inlined_call_operand.vmem [shape: bf16[32,256], index: 2, kind: input, shape index: {}]   ;;  %s1189_s3 = inlined_call_operand.vmem [shape: f32[16,16], index: 3, kind: input, shape index: {}]   ;;  %s1190_s4 = inlined_call_operand.hbm [shape: f32[32,128], index: 4, kind: output, shape index: {0}]   ;;  %s1191_s5 = inlined_call_operand.hbm [shape: f32[1,1], index: 5, kind: output, shape index: {1}]  }
   0x1   :  { %v985_v0 = vld [vmem:[%s1186_s0 + $0x10] sm:$0xff]  ;;  %v990_v1 = vld [vmem:[%s1186_s0] sm:$0xff]  ;;  %v995_v2 = vld [vmem:[%s1186_s0 + $0x18] sm:$0xff]  ;;  %864 = vset.pattern.permute.xlu1 %v941_v3  ;;  %863 = vset.pattern.permute.xlu0 %v941_v3 }
   0x2   :  { %v840_v4 = vtrunc.f32 %v985_v0  ;;  %v836_v5 = vtrunc.f32 %v990_v1  ;;  %v842_v6 = vtrunc.f32 %v995_v2  ;;  %v1005_v7 = vld [vmem:[%s1186_s0 + $0x8] sm:$0xff]  ;;  %v867_v9 = vld [vmem:[%s1187_s1] sm:$0xff]   ;;  %236 = vmatprep.mubr.bf16.mxu1 %v941_v3  ;;  %v869_v15 = vld [vmem:[%s1187_s1 + $0x10] sm:$0xff]  }
   0x3   :  { %v838_v8 = vtrunc.f32 %v1005_v7  ;;  %v868_v12 = vld [vmem:[%s1187_s1 + $0x8] sm:$0xff]   ;;  %794 = vmatprep.subr.bf16.mxu0 %v867_v9 }
   0x4   :  { %v841_v10 = vcvt.f32.s32 %v840_v4  ;;  %v837_v11 = vcvt.f32.s32 %v836_v5  ;;  %v843_v13 = vcvt.f32.s32 %v842_v6  ;;  %795 = vmatpush3.bf16.msra.mxu0 %v867_v9 }
   0x5   :  { %v839_v14 = vcvt.f32.s32 %v838_v8  ;;  %796 = vmatprep.subr.bf16.mxu0 %v868_v12 }
   0x6   :  { %39 = vperm.xlu1 %864, %v841_v10   ;;  %33 = vperm.xlu0 %863, %v837_v11  }
   0x8   :  { %797 = vmatpush3.bf16.msra.mxu0 %v868_v12 }
   0xa   :  { %42 = vperm.xlu1 %864, %v843_v13   ;;  %36 = vperm.xlu0 %863, %v839_v14  }
   0xb   :  { %12 = vsyncpa [#allocation4], 0  ;;  %798 = vmatprep.subr.bf16.mxu0 %v869_v15  ;;  %v870_v16 = vld [vmem:[%s1187_s1 + $0x18] sm:$0xff]   ;;  %v875_v17 = vld [vmem:[%s1188_s2 + $0x4] ss:$8 sps:$4 sm:$0xff]   ;;  %v30_v23 = vlaneseq  ;;  %v943_v32 = vmov 3  }
   0xc   :  { %v877_v18 = vld [vmem:[%s1188_s2] ss:$8 sps:$4 sm:$0xff]   ;;  %799 = vmatpush3.bf16.msra.mxu0 %v869_v15  ;;  %204 = vmatprep.subr.bf16.mxu1 %v875_v17  ;;  %v873_v21 = vld [vmem:[%s1187_s1 + $0x30] sm:$0xff]   ;;  %v874_v22 = vld [vmem:[%s1187_s1 + $0x38] sm:$0xff]   ;;  %v942_v29 = vmov 1.0|1.0  }
   0xd   :  { %800 = vmatprep.subr.bf16.mxu0 %v870_v16  ;;  %v871_v19 = vld [vmem:[%s1187_s1 + $0x20] sm:$0xff]   ;;  %205 = vmatpush1.bf16.msra.mxu1 %v877_v18  ;;  %v872_v20 = vld [vmem:[%s1187_s1 + $0x28] sm:$0xff]   ;;  %v1043_v26 = vand.u32 127, %v30_v23  ;;  %v878_v30 = vld [vmem:[%s1188_s2 + $0x14] ss:$8 sps:$4 sm:$0xff]   ;;  %vm197_vm6 = vcmask 261120  }
   0xe   :  { %v880_v31 = vld [vmem:[%s1188_s2 + $0x10] ss:$8 sps:$4 sm:$0xff]   ;;  %206 = vmatprep.subr.bf16.mxu1 %v878_v30  ;;  %865 = vset.pattern.permute.xlu0 %v943_v32  ;;  %v381_v39 = vld [vmem:[%s1189_s3] sm:$0xff]  ;;  %vm383_vm7 = vcmask 130048   ;;  %v266_v40 = vshrl.u32 %v30_v23, 7  ;;  %s946_s26 = smov 2  }
   0xf   :  { %866 = vset.pattern.permute.xlu1 %v943_v32  ;;  %359 = vperm.xlu0 %865, %v990_v1   ;;  %vm482_vm10 = vcmp.gt.f32.partialorder %v1005_v7, 0.0  ;;  %vm481_vm11 = vcmp.gt.f32.partialorder %v990_v1, 0.0  ;;  %s947_s27 = smov 126   ;;  %vm642_vm12 = vcmp.gt.f32.partialorder %v995_v2, 0.0  ;;  %vm641_vm13 = vcmp.gt.f32.partialorder %v985_v0, 0.0  ;;  %s948_s28 = smov [#allocation2]  }
  0x10   :  { %801 = vmatpush3.bf16.msra.mxu0 %v870_v16  ;;  %364 = vperm.xlu1 %866, %v1005_v7   ;;  %vm267_vm8 = vcmp.lt.s32.totalorder %v266_v40, 1  ;;  %vm348_vm9 = vcmp.lt.s32.totalorder %v266_v40, 7  ;;  %vm503_vm14 = vcmask 7168   ;;  %s726_s29 = sshll.u32 %s948_s28, 4  ;;  %s727_s29 = int_to_ptr.vmem [resolvable:$true] %s726_s29 }
  0x11   :  { %802 = vmatprep.subr.bf16.mxu0 %v871_v19  ;;  %207 = vmatpush1.bf16.msra.mxu1 %v880_v31  ;;  %s905_s0 = scalar_lea.vmem %s727_s29, 512  ;;  %p910_p1 = scmp.lt.s32.totalorder %s727_s29, %s727_s29 }
  0x12   :  { %p906_p0 = scmp.ne.s32.totalorder %s727_s29, %s905_s0  ;;  %p911_p2 = scmp.lt.s32.totalorder %s905_s0, %s905_s0 }
  0x13   :  { %374 = vperm.xlu0 %865, %v995_v2  }
  0x14   :  { %803 = vmatpush3.bf16.msra.mxu0 %v871_v19  ;;  %369 = vperm.xlu1 %866, %v985_v0   ;;  %v382_v19 = vld [vmem:[%s1189_s3 + $0x8] sm:$0xff]  ;;  %s945_s3 = smov 127   ;;  %p912_p3 = por %p911_p2, %p910_p1 }
  0x15   :  { %804 = vmatprep.subr.bf16.mxu0 %v872_v20 }
  0x16   :  { %p913_p4 = pnand %p912_p3, %p906_p0 }
  0x18   :  { %805 = vmatpush3.bf16.msra.mxu0 %v872_v20 }
  0x19   :  { %806 = vmatprep.subr.bf16.mxu0 %v873_v21 }
  0x1c   :  { %807 = vmatpush3.bf16.msra.mxu0 %v873_v21 }
  0x1d   :  { %808 = vmatprep.subr.bf16.mxu0 %v874_v22 }
  0x20   :  { %809 = vmatpush3.bf16.msra.mxu0 %v874_v22 }
  0x85   :  { %v1039_v24 = vpop.permute.xlu1 %39  ;;  %v1041_v25 = vpop.permute.xlu0 %33 }
  0x86   :  { %vm46_vm0 = vcmp.eq.s32.totalorder %v1043_v26, %v1039_v24  ;;  %vm44_vm3 = vcmp.eq.s32.totalorder %v1043_v26, %v1041_v25 }
  0x89   :  { %v1045_v27 = vpop.permute.xlu1 %42  ;;  %v1047_v28 = vpop.permute.xlu0 %36 }
  0x8a   :  { %vm47_vm1 = vcmp.eq.s32.totalorder %v1043_v26, %v1045_v27  ;;  %vm45_vm2 = vcmp.eq.s32.totalorder %v1043_v26, %v1047_v28 }
  0x8b   :  { %vm764_vm4 = vmpackc.low %vm47_vm1, %vm46_vm0 }
  0x8c   :  { %vm762_vm5 = vmpackc.low %vm45_vm2, %vm44_vm3 }
  0x8d   :  { %810 = vmatprep.mubr.msk.bf16.mxu0 %vm762_vm5, %v942_v29 }
  0x8e   :  { %811 = vmatmul.mubr.msk.bf16.vlgmr.msra.gmra.mrb[0].mxu0 %vm764_vm4, %v942_v29  ;;  %v360_v56 = vpop.permute.xlu0 %359 }
  0x8f   :  { %v365_v53 = vpop.permute.xlu1 %364 }
  0x92   :  { %v375_v10 = vpop.permute.xlu0 %374 }
  0x93   :  { %v370_v8 = vpop.permute.xlu1 %369 }
 0x161   :  { %v812_v33 = vpop.f32.mrb[0].mxu0 }
 0x162   :  { %v156_v34 = vpop.f32.mrb[1].mxu0 }
 0x163   :  { %v813_v35 = vpop.f32.mrb[2].mxu0 }
 0x164   :  { %v172_v36 = vpack.c.bf16 %v813_v35, %v812_v33  ;;  %v159_v37 = vpop.f32.mrb[3].mxu0 }
 0x165   :  { %v171_v38 = vpack.c.bf16 %v159_v37, %v156_v34 }
 0x167   :  { %770 = vmatmul.mubr.msk.bf16.vlgmr.msra.gmra.mrb[0].mxu1 %vm197_vm6, %v171_v38 }
 0x168   :  { %246 = vmatprep.mubr.bf16.mxu1 %v941_v3 }
 0x16f   :  { %771 = vmatmul.mubr.msk.bf16.gmra.mrb[4].mxu1 %vm197_vm6, %v172_v36 }
 0x170   :  { %818 = vmatprep.mubr.msk.f32.mxu1 %vm383_vm7, %v381_v39 }
 0x23a   :  { %v238_v41 = vpop.f32.mrb[0].mxu1 }
 0x23b   :  { %257 = vst [vmem:[#allocation2] sm:$0xff] %v238_v41  ;;  %v240_v42 = vpop.f32.mrb[1].mxu1  ;;  %v261_v44 = vrot.slane %v238_v41, 7  ;;  %v944_v41 = vmov 0.0  }
 0x23c   :  { %v242_v43 = vpop.f32.mrb[2].mxu1  ;;  %v344_v47 = vrot.slane %v240_v42, 1 }
 0x23d   :  { %258 = vst [vmem:[#allocation2 + $0x8] sm:$0xff] %v242_v43  ;;  %v262_v45 = vrot.slane %v242_v43, 7  ;;  %v244_v46 = vpop.f32.mrb[3].mxu1  ;;  %v751_v43 = vsel %vm45_vm2, 1.0, %v944_v41 }
 0x23e   :  { %v345_v48 = vrot.slane %v244_v46, 1 }
 0x23f   :  { %v1085_v49 = vsel %vm267_vm8, %v261_v44, %v262_v45 }
 0x240   :  { %274 = vmax.xlane.f32.xlu0 %v1085_v49  ;;  %v351_v50 = vsel %vm348_vm9, %v344_v47, %v345_v48 }
 0x241   :  { %v353_v51 = vsub.f32 %v351_v50, %v240_v42  ;;  %v750_v42 = vsel %vm44_vm3, 1.0, %v944_v41 }
 0x242   :  { %v248_v52 = vpop.f32.mrb[4].mxu1 }
 0x243   :  { %259 = vst [vmem:[#allocation2 + $0x10] sm:$0xff] %v248_v52  ;;  %v263_v54 = vrot.slane %v248_v52, 7  ;;  %v250_v55 = vpop.f32.mrb[5].mxu1  ;;  %v377_v11 = vmul.f32 %v360_v56, %v353_v51 }
 0x244   :  { %v346_v57 = vrot.slane %v250_v55, 1  ;;  %v252_v58 = vpop.f32.mrb[6].mxu1 }
 0x245   :  { %260 = vst [vmem:[#allocation2 + $0x18] sm:$0xff] %v252_v58  ;;  %v264_v59 = vrot.slane %v252_v58, 7  ;;  %v254_v60 = vpop.f32.mrb[7].mxu1  ;;  %v1090_v61 = vsel %vm267_vm8, %v262_v45, %v263_v54 }
 0x246   :  { %v347_v62 = vrot.slane %v254_v60, 1  ;;  %v350_v63 = vsel %vm348_vm9, %v345_v48, %v346_v57  ;;  %276 = vmax.xlane.f32.xlu0 %v1090_v61 }
 0x247   :  { %v354_v3 = vsub.f32 %v350_v63, %v244_v46  ;;  %v271_v4 = vsel %vm267_vm8, %v264_v59, %v261_v44  ;;  %v268_v5 = vsel %vm267_vm8, %v263_v54, %v264_v59  ;;  %v317_v44 = vmul.f32 %v751_v43, %v1085_v49 }
 0x248   :  { %v352_v6 = vsel %vm348_vm9, %v347_v62, %v344_v47  ;;  %272 = vmax.xlane.f32.xlu1 %v271_v4  ;;  %v349_v9 = vsel %vm348_vm9, %v346_v57, %v347_v62  ;;  %v316_v45 = vmul.f32 %v750_v42, %v271_v4  ;;  %v752_v46 = vsel %vm46_vm0, 1.0, %v944_v41 }
 0x249   :  { %v356_v12 = vsub.f32 %v352_v6, %v254_v60  ;;  %v378_v13 = vmul.f32 %v365_v53, %v354_v3  ;;  %v355_v14 = vsub.f32 %v349_v9, %v250_v55  ;;  %v753_v47 = vsel %vm47_vm1, 1.0, %v944_v41 }
 0x24a   :  { %v319_v48 = vmul.f32 %v753_v47, %v268_v5  ;;  %v318_v25 = vmul.f32 %v752_v46, %v1090_v61 }
 0x24b   :  { %v828_v15 = vpack.c.bf16 %v378_v13, %v377_v11  ;;  %v379_v16 = vmul.f32 %v370_v8, %v355_v14  ;;  %v380_v17 = vmul.f32 %v375_v10, %v356_v12 }
 0x24c   :  { %278 = vmax.xlane.f32.xlu1 %v268_v5 }
 0x24d   :  { %v832_v18 = vpack.c.bf16 %v380_v17, %v379_v16  ;;  %829 = vmatprep.subr.bf16.mxu1 %v828_v15 }
 0x24e   :  { %831 = vmatpush3.bf16.msra.mxu1 %v828_v15 }
 0x24f   :  { %833 = vmatprep.subr.bf16.mxu1 %v832_v18 }
 0x251   :  { %819 = vmatmul.mubr.msk.f32.vlgmr.msra.gmra.mrb[8].mxu1 %vm383_vm7, %v382_v19 }
 0x252   :  { %835 = vmatpush3.bf16.msra.mxu1 %v832_v18  ;;  %825 = vmatprep.mubr.msk.f32.mxu1 %vm383_vm7, %v381_v39 }
 0x255   :  { %826 = vmatmul.mubr.msk.f32.vlgmr.msra.gmra.mrb[10].mxu1 %vm383_vm7, %v382_v19 }
 0x2cd   :  { %v275_v20 = vpop.xlane.xlu0 %274 }
 0x2ce   :  { %v281_v21 = vsub.f32 %v1085_v49, %v275_v20 }
 0x2d0   :  { %v286_v22 = vmul.f32 1.442695, %v281_v21 }
 0x2d2   :  { %881 = vpow2.f32 %v286_v22 }
 0x2d3   :  { %v1105_v23 = vpop.xlane.xlu0 %276 }
 0x2d4   :  { %v282_v29 = vsub.f32 %v1090_v61, %v1105_v23 }
 0x2d5   :  { %v273_v30 = vpop.xlane.xlu1 %272 }
 0x2d6   :  { %v280_v31 = vsub.f32 %v271_v4, %v273_v30  ;;  %v288_v33 = vmul.f32 1.442695, %v282_v29 }
 0x2d8   :  { %v284_v32 = vmul.f32 1.442695, %v280_v31 }
 0x2d9   :  { %v1109_v34 = vpop.xlane.xlu1 %278 }
 0x2da   :  { %883 = vpow2.f32 %v284_v32  ;;  %v283_v35 = vsub.f32 %v268_v5, %v1109_v34 }
 0x2db   :  { %885 = vpow2.f32 %v288_v33 }
 0x2dc   :  { %v882_v36 = vpop.eup %881  ;;  %v290_v37 = vmul.f32 1.442695, %v283_v35 }
 0x2dd   :  { %294 = vadd.xlane.f32.xlu1 %v882_v36 }
 0x2de   :  { %887 = vpow2.f32 %v290_v37 }
 0x2e4   :  { %v884_v38 = vpop.eup %883 }
 0x2e5   :  { %292 = vadd.xlane.f32.xlu0 %v884_v38  ;;  %v886_v39 = vpop.eup %885 }
 0x2e8   :  { %v888_v40 = vpop.eup %887 }
 0x2e9   :  { %298 = vadd.xlane.f32.xlu1 %v888_v40  ;;  %296 = vadd.xlane.f32.xlu0 %v886_v39 }
 0x2ed   :  { %322 = vadd.xlane.f32.xlu1 %v317_v44  ;;  %320 = vadd.xlane.f32.xlu0 %v316_v45 }
 0x2f1   :  { %326 = vadd.xlane.f32.xlu1 %v319_v48  ;;  %324 = vadd.xlane.f32.xlu0 %v318_v25 }
 0x302   :  { %467 = vrot.lane.b32.xlu1 %v1005_v7, %s945_s3 }
 0x306   :  { %625 = vrot.lane.b32.xlu1 %v985_v0, %s945_s3 }
 0x307   :  { %465 = vrot.lane.b32.xlu0 %v990_v1, %s945_s3 }
 0x30b   :  { %627 = vrot.lane.b32.xlu0 %v995_v2, %s945_s3 }
 0x324   :  { %v820_v24 = vpop.f32.mrb[8].mxu1 }
 0x325   :  { %v456_v28 = vpop.f32.mrb[9].mxu1 }
 0x328   :  { %v1130_v49 = vpop.f32.mrb[10].mxu1 }
 0x329   :  { %v1132_v26 = vpop.f32.mrb[11].mxu1 }
 0x36a   :  { %v295_v27 = vpop.xlane.xlu1 %294 }
 0x36b   :  { %889 = vlog2.f32 %v295_v27 }
 0x372   :  { %v293_v50 = vpop.xlane.xlu0 %292 }
 0x373   :  { %891 = vlog2.f32 %v293_v50 }
 0x375   :  { %v890_v51 = vpop.eup %889 }
 0x376   :  { %v303_v52 = vmul.f32 0.6931472, %v890_v51  ;;  %v299_v53 = vpop.xlane.xlu1 %298  ;;  %v297_v54 = vpop.xlane.xlu0 %296 }
 0x377   :  { %893 = vlog2.f32 %v299_v53 }
 0x378   :  { %895 = vlog2.f32 %v297_v54  ;;  %v309_v55 = vadd.f32 %v303_v52, %v275_v20 }
 0x37a   :  { %v323_v56 = vpop.xlane.xlu1 %322  ;;  %v321_v57 = vpop.xlane.xlu0 %320 }
 0x37b   :  { %v329_v58 = vsub.f32 %v323_v56, %v309_v55 }
 0x37d   :  { %v892_v59 = vpop.eup %891  ;;  %v333_v60 = vsub.f32 %v329_v58, %v329_v58 }
 0x37e   :  { %v301_v61 = vmul.f32 0.6931472, %v892_v59  ;;  %v327_v62 = vpop.xlane.xlu1 %326  ;;  %v325_v63 = vpop.xlane.xlu0 %324 }
 0x37f   :  { %v338_v3 = vmul.f32 1.442695, %v333_v60 }
 0x380   :  { %v308_v4 = vadd.f32 %v301_v61, %v273_v30 }
 0x381   :  { %v894_v5 = vpop.eup %893  ;;  %897 = vpow2.f32 %v338_v3 }
 0x382   :  { %v896_v6 = vpop.eup %895  ;;  %v307_v8 = vmul.f32 0.6931472, %v894_v5  ;;  %v328_v9 = vsub.f32 %v321_v57, %v308_v4  ;;  %v468_v10 = vpop.permute.xlu1 %467 }
 0x383   :  { %v466_v11 = vpop.permute.xlu0 %465  ;;  %v305_v12 = vmul.f32 0.6931472, %v896_v6  ;;  %v472_v13 = vadd.f32 %v820_v24, %v468_v10 }
 0x384   :  { %v471_v14 = vadd.f32 %v466_v11, %v456_v28  ;;  %v332_v15 = vsub.f32 %v328_v9, %v328_v9  ;;  %v311_v16 = vadd.f32 %v307_v8, %v1109_v34 }
 0x385   :  { %v310_v17 = vadd.f32 %v305_v12, %v1105_v23  ;;  %v518_v18 = vmul.f32 %v472_v13, %v472_v13 }
 0x386   :  { %v517_v19 = vmul.f32 %v471_v14, %v471_v14  ;;  %v336_v20 = vmul.f32 1.442695, %v332_v15  ;;  %v331_v21 = vsub.f32 %v327_v62, %v311_v16  ;;  %v626_v40 = vpop.permute.xlu1 %625 }
 0x387   :  { %v330_v22 = vsub.f32 %v325_v63, %v310_v17  ;;  %523 = vrot.lane.b32.xlu0 %v518_v18, %s946_s26  ;;  %v628_v39 = vpop.permute.xlu0 %627  ;;  %v631_v46 = vadd.f32 %v626_v40, %v1132_v26 }
 0x388   :  { %521 = vrot.lane.b32.xlu1 %v517_v19, %s946_s26  ;;  %v335_v29 = vsub.f32 %v331_v21, %v331_v21  ;;  %899 = vpow2.f32 %v336_v20  ;;  %v632_v45 = vadd.f32 %v1130_v49, %v628_v39 }
 0x389   :  { %v334_v30 = vsub.f32 %v330_v22, %v330_v22  ;;  %v676_v26 = vmul.f32 %v631_v46, %v631_v46 }
 0x38a   :  { %v342_v31 = vmul.f32 1.442695, %v335_v29  ;;  %v677_v56 = vmul.f32 %v632_v45, %v632_v45 }
 0x38b   :  { %v898_v32 = vpop.eup %897  ;;  %v340_v33 = vmul.f32 1.442695, %v334_v30 }
 0x38c   :  { %901 = vpow2.f32 %v342_v31  ;;  %v476_v34 = vmax.f32 %v898_v32, 0.85  ;;  %v474_v35 = vmul.f32 %v898_v32, %v472_v13 }
 0x38d   :  { %903 = vpow2.f32 %v340_v33 }
 0x38e   :  { %v478_v23 = vmin.f32 %v476_v34, 1.15 }
 0x390   :  { %v480_v36 = vmul.f32 %v478_v23, %v472_v13 }
 0x392   :  { %v484_v37 = vmin.f32 %v474_v35, %v480_v36  ;;  %v900_v38 = vpop.eup %899 }
 0x393   :  { %v475_v42 = vmax.f32 %v900_v38, 0.85  ;;  %v473_v55 = vmul.f32 %v900_v38, %v471_v14 }
 0x394   :  { %489 = vrot.lane.b32.xlu0 %v484_v37, %s946_s26 }
 0x395   :  { %v477_v25 = vmin.f32 %v475_v42, 1.15 }
 0x396   :  { %v902_v41 = vpop.eup %901 }
 0x397   :  { %v904_v43 = vpop.eup %903  ;;  %v636_v44 = vmax.f32 %v902_v41, 0.85  ;;  %v634_v28 = vmul.f32 %v902_v41, %v632_v45  ;;  %v479_v53 = vmul.f32 %v477_v25, %v471_v14 }
 0x398   :  { %v635_v47 = vmax.f32 %v904_v43, 0.85  ;;  %v633_v50 = vmul.f32 %v904_v43, %v631_v46 }
 0x399   :  { %v638_v48 = vmin.f32 %v636_v44, 1.15  ;;  %v483_v49 = vmin.f32 %v473_v55, %v479_v53 }
 0x39a   :  { %v637_v24 = vmin.f32 %v635_v47, 1.15 }
 0x39b   :  { %v640_v27 = vmul.f32 %v638_v48, %v632_v45 }
 0x39c   :  { %v639_v51 = vmul.f32 %v637_v24, %v631_v46 }
 0x39d   :  { %v644_v52 = vmin.f32 %v634_v28, %v640_v27 }
 0x39e   :  { %v643_v54 = vmin.f32 %v633_v50, %v639_v51 }
 0x39f   :  { %649 = vrot.lane.b32.xlu0 %v644_v52, %s946_s26 }
 0x3a0   :  { %647 = vrot.lane.b32.xlu1 %v643_v54, %s946_s26 }
 0x3a3   :  { %682 = vrot.lane.b32.xlu0 %v677_v56, %s946_s26 }
 0x3a4   :  { %487 = vrot.lane.b32.xlu1 %v483_v49, %s946_s26 }
 0x3a8   :  { %680 = vrot.lane.b32.xlu1 %v676_v26, %s946_s26 }
 0x3f9   :  { %v524_v57 = vpop.permute.xlu0 %523 }
 0x3fa   :  { %v522_v58 = vpop.permute.xlu1 %521  ;;  %v528_v59 = vsel %vm482_vm10, %v524_v57, 0.0 }
 0x3fb   :  { %v527_v60 = vsel %vm481_vm11, %v522_v58, 0.0  ;;  %533 = vrot.lane.b32.xlu0 %v528_v59, %s947_s27 }
 0x3fc   :  { %531 = vrot.lane.b32.xlu1 %v527_v60, %s947_s27 }
 0x406   :  { %v490_v61 = vpop.permute.xlu0 %489 }
 0x407   :  { %v494_v62 = vsel %vm482_vm10, %v490_v61, 0.0 }
 0x408   :  { %499 = vrot.lane.b32.xlu0 %v494_v62, %s947_s27 }
 0x411   :  { %v650_v63 = vpop.permute.xlu0 %649 }
 0x412   :  { %v648_v7 = vpop.permute.xlu1 %647  ;;  %v654_v3 = vsel %vm642_vm12, %v650_v63, 0.0 }
 0x413   :  { %v653_v4 = vsel %vm641_vm13, %v648_v7, 0.0  ;;  %659 = vrot.lane.b32.xlu0 %v654_v3, %s947_s27 }
 0x414   :  { %657 = vrot.lane.b32.xlu1 %v653_v4, %s947_s27 }
 0x415   :  { %v683_v5 = vpop.permute.xlu0 %682 }
 0x416   :  { %v488_v6 = vpop.permute.xlu1 %487  ;;  %v687_v8 = vsel %vm642_vm12, %v683_v5, 0.0 }
 0x417   :  { %v493_v9 = vsel %vm481_vm11, %v488_v6, 0.0  ;;  %692 = vrot.lane.b32.xlu0 %v687_v8, %s947_s27 }
 0x418   :  { %497 = vrot.lane.b32.xlu1 %v493_v9, %s947_s27 }
 0x41a   :  { %v681_v10 = vpop.permute.xlu1 %680 }
 0x41b   :  { %v686_v11 = vsel %vm641_vm13, %v681_v10, 0.0 }
 0x41c   :  { %690 = vrot.lane.b32.xlu1 %v686_v11, %s947_s27 }
 0x46d   :  { %v534_v2 = vpop.permute.xlu0 %533 }
 0x46e   :  { %v532_v0 = vpop.permute.xlu1 %531  ;;  %v538_v12 = vsel %vm503_vm14, %v534_v2, 0.0 }
 0x46f   :  { %v537_v13 = vsel %vm503_vm14, %v532_v0, 0.0 }
 0x470   :  { %v539_v14 = vadd.f32 %v538_v12, %v537_v13 }
 0x472   :  { %540 = vadd.xlane.f32.xlu0 %v539_v14 }
 0x47a   :  { %v500_v15 = vpop.permute.xlu0 %499 }
 0x47b   :  { %v505_v21 = vsel %vm503_vm14, %v500_v15, 0.0 }
 0x485   :  { %v660_v16 = vpop.permute.xlu0 %659 }
 0x486   :  { %v658_v17 = vpop.permute.xlu1 %657  ;;  %v664_v1 = vsel %vm503_vm14, %v660_v16, 0.0 }
 0x487   :  { %v663_v18 = vsel %vm503_vm14, %v658_v17, 0.0 }
 0x488   :  { %v665_v19 = vadd.f32 %v664_v1, %v663_v18 }
 0x489   :  { %v693_v29 = vpop.permute.xlu0 %692 }
 0x48a   :  { %v498_v20 = vpop.permute.xlu1 %497  ;;  %666 = vadd.xlane.f32.xlu0 %v665_v19  ;;  %v697_v32 = vsel %vm503_vm14, %v693_v29, 0.0 }
 0x48b   :  { %v504_v22 = vsel %vm503_vm14, %v498_v20, 0.0 }
 0x48c   :  { %v506_v30 = vadd.f32 %v505_v21, %v504_v22 }
 0x48e   :  { %v691_v31 = vpop.permute.xlu1 %690  ;;  %507 = vadd.xlane.f32.xlu1 %v506_v30 }
 0x48f   :  { %v696_v33 = vsel %vm503_vm14, %v691_v31, 0.0 }
 0x490   :  { %v698_v34 = vadd.f32 %v697_v32, %v696_v33 }
 0x492   :  { %699 = vadd.xlane.f32.xlu1 %v698_v34 }
 0x493   :  { %916 = shalt.err (!%p913_p4)
}
 0x494   :  { %s917_s7 = scalar_lea.hbm %s1190_s4, 512 }
 0x495   :  { %p918_p5 = scmp.ne.s32.totalorder %s1190_s4, %s917_s7  ;;  %p921_p6 = scmp.lt.u32.totalorder %s917_s7, %s1190_s4 }
 0x497   :  { %p923_p7 = pnand %p921_p6, %p918_p5 }
 0x499   :  { %926 = shalt.err (!%p923_p7)
}
 0x49a   :  { %s949_s12 = smov 128   ;;  %s950_s13 = smov 8  }
 0x49b   :  { %732 = dma.vmem_to_hbm [thread:$0]  %s727_s29, 512, %s1190_s4, [#allocation3], %s949_s12, %s949_s12, %s950_s13  }
 0x49c   :  { %s927_s26 = scalar_lea.hbm %s1191_s5, 16 }
 0x49d   :  { %p928_p8 = scmp.ne.s32.totalorder %s1191_s5, %s927_s26  ;;  %p931_p9 = scmp.lt.u32.totalorder %s927_s26, %s1191_s5 }
 0x49f   :  { %p933_p10 = pnand %p931_p9, %p928_p8 }
 0x4ff   :  { %v541_v23 = vpop.xlane.xlu0 %540 }
 0x500   :  { %v542_v35 = vrot.slane %v541_v23, 4 }
 0x502   :  { %v543_v36 = vadd.f32 %v542_v35, %v541_v23 }
 0x504   :  { %v544_v40 = vrot.slane %v543_v36, 2 }
 0x506   :  { %v545_v46 = vadd.f32 %v544_v40, %v543_v36 }
 0x508   :  { %v546_v27 = vrot.slane %v545_v46, 1 }
 0x50a   :  { %v547_v55 = vadd.f32 %v546_v27, %v545_v46 }
 0x517   :  { %v667_v37 = vpop.xlane.xlu0 %666 }
 0x518   :  { %v668_v38 = vrot.slane %v667_v37, 4 }
 0x51a   :  { %v669_v39 = vadd.f32 %v668_v38, %v667_v37 }
 0x51b   :  { %v508_v41 = vpop.xlane.xlu1 %507 }
 0x51c   :  { %v670_v42 = vrot.slane %v669_v39, 2  ;;  %v509_v43 = vrot.slane %v508_v41, 4 }
 0x51e   :  { %v510_v44 = vadd.f32 %v509_v43, %v508_v41  ;;  %v671_v47 = vadd.f32 %v670_v42, %v669_v39 }
 0x51f   :  { %v700_v45 = vpop.xlane.xlu1 %699 }
 0x520   :  { %v511_v48 = vrot.slane %v510_v44, 2  ;;  %v701_v25 = vrot.slane %v700_v45, 4  ;;  %v672_v52 = vrot.slane %v671_v47, 1 }
 0x522   :  { %v702_v24 = vadd.f32 %v701_v25, %v700_v45  ;;  %v512_v28 = vadd.f32 %v511_v48, %v510_v44  ;;  %v673_v56 = vadd.f32 %v672_v52, %v671_v47 }
 0x524   :  { %v703_v50 = vrot.slane %v702_v24, 2  ;;  %v513_v51 = vrot.slane %v512_v28, 1 }
 0x526   :  { %v704_v53 = vadd.f32 %v703_v50, %v702_v24  ;;  %v514_v54 = vadd.f32 %v513_v51, %v512_v28 }
 0x528   :  { %844 = vpush %v514_v54  ;;  %v705_v49 = vrot.slane %v704_v53, 1 }
 0x529   :  { %846 = vpush %v547_v55 }
 0x52a   :  { %848 = vpush %v673_v56  ;;  %v706_v26 = vadd.f32 %v705_v49, %v704_v53 }
 0x52c   :  { %850 = vpush %v706_v26 }
 0x559   :  { %s845_s4 = spop %844 }
 0x55a   :  { %s847_s16 = spop %846 }
 0x55b   :  { %s849_s17 = spop %848 }
 0x55c   :  { %s675_s18 = sadd.f32 %s849_s17, %s845_s4 }
 0x55d   :  { %s851_s19 = spop %850 }
 0x55e   :  { %s709_s1 = ssub.f32 0.0, %s675_s18 }
 0x55f   :  { %s708_s20 = sadd.f32 %s851_s19, %s847_s16 }
 0x560   :  { %s712_s21 = smul.f32 0.0625, %s709_s1 }
 0x561   :  { %s715_s22 = smul.f32 0.0625, %s708_s20 }
 0x562   :  { %s716_s2 = smul.f32 0.5, %s712_s21 }
 0x563   :  { %s717_s23 = smul.f32 0.5, %s715_s22 }
 0x565   :  { %s718_s24 = sadd.f32 %s717_s23, %s716_s2 }
 0x567   :  { %720 = sst [smem:[#allocation5]] %s718_s24 }
 0x568   :  { %936 = shalt.err (!%p933_p10)
}
 0x569   :  { %s951_s30 = smov [#allocation5]  }
 0x56a   :  { %740 = dma.smem_to_hbm %s951_s30, 16, %s1191_s5, [#allocation4]  }
 0x56b   :  { %937 = dma.done.wait [#allocation3], 512  }
 0x56c   :  { %938 = vsyncadd [#allocation3], 4294966784 }
 0x56d   :  { %939 = dma.done.wait [#allocation4], 16  }
 0x56e   :  { %940 = vsyncadd [#allocation4], 4294967280 }
 0x56f   :  { %747 = sfence }
 0x570   :  { %748 = vsyncpa [#allocation3], 1 }
 0x571   :  { %749 = vsyncpa [#allocation4], 1 }

</bundles_post_ra>
